<compile_context>
chip_gen: v5e
topology: v5e:2x2
jax: 0.10.0
libtpu: 0.0.40
codegen_flags: <defaults>
</compile_context>

<pallas_src>
import functools

import jax
import jax.numpy as jnp
from jax.experimental import pallas as pl
from jax.experimental.pallas import tpu as pltpu


HID = 64
NUM_LAYERS = 3
NUM_CLASSES = 3
C_PAD = 128  # lane-dense padded width of the final output block


# ----------------------------- Pallas kernel ------------------------------

def gnn_fused_kernel(x_ref, adj_ref, pool_ref, inv_cnt_ref,
                     w_ref, att_ref, bias_ref,
                     lin1_w_ref, lin1_b_ref, lin2_w_ref, lin2_b_ref,
                     out_ref):
    """Whole GNN forward (eval): 3x(GATConv+ReLU) -> mean pool -> MLP head."""
    adj = adj_ref[...]                       # (N, N) 0/1 mask, f32
    h = x_ref[...]                           # (N, HID) f32 (channel-padded x)
    num_layers = w_ref.shape[0]

    for l in range(num_layers):              # static unroll: 3 tiny layers
        w = w_ref[l]                         # (HID, HID) bf16
        att = att_ref[l]                     # (HID, 2) bf16 [:,0]=src [:,1]=dst
        b = bias_ref[l]                      # (1, HID) f32

        hw = jnp.dot(h.astype(jnp.bfloat16), w,
                     preferred_element_type=jnp.float32)            # (N, HID)
        hw_b = hw.astype(jnp.bfloat16)

        # Both attention projections in one MXU matmul.
        proj = jnp.dot(hw_b, att, preferred_element_type=jnp.float32)  # (N, 2)
        a_src = proj[:, 0:1]                                            # (N,1)
        a_dst = proj[:, 1:2]                                            # (N,1)

        # e[i, j] = LeakyReLU(a_dst[i] + a_src[j], 0.2), masked to edges.
        e = a_dst + a_src.T                                             # (N,N)
        e = jnp.where(e > 0, e, 0.2 * e)
        e = jnp.where(adj > 0.0, e, -1e30)
        m = jnp.max(e, axis=-1, keepdims=True)
        p = jnp.exp(e - m)                   # masked entries underflow to 0.0
        denom = jnp.sum(p, axis=-1, keepdims=True)    # >= 1 term (self-loop)
        alpha = p * pl.reciprocal(denom, approx=True)        # EUP vrcp slot

        out = jnp.dot(alpha.astype(jnp.bfloat16), hw_b,
                      preferred_element_type=jnp.float32) + b
        h = jnp.maximum(out, 0.0)            # F.relu

    # global_mean_pool: exact 0/1 one-hot matmul + f32 normalization.
    pooled = jnp.dot(pool_ref[...].astype(jnp.bfloat16),
                     h.astype(jnp.bfloat16),
                     preferred_element_type=jnp.float32) * inv_cnt_ref[...]

    z = jnp.dot(pooled.astype(jnp.bfloat16), lin1_w_ref[...],
                preferred_element_type=jnp.float32) + lin1_b_ref[...]
    z = jnp.maximum(z, 0.0)                  # F.relu
    # F.dropout(p=0.5, training=False) is the identity in eval mode.
    # TODO(synk): training-mode dropout (pltpu.prng_random_bits mask) not emitted.
    out_ref[...] = jnp.dot(z.astype(jnp.bfloat16), lin2_w_ref[...],
                           preferred_element_type=jnp.float32) + lin2_b_ref[...]


# ------------------------------ JAX wrapper -------------------------------

_VMEM = pl.BlockSpec(memory_space=pltpu.MemorySpace.VMEM)


def _pack_params(params):
    """Stack / pad per-layer GAT params so the fused kernel sees uniform shapes."""
    layers = [params["conv1"]] + list(params["convs"])
    ws, atts, biases = [], [], []
    for (w, att_src, att_dst, bias) in layers:
        c_in = w.shape[0]
        ws.append(jnp.pad(w, ((0, HID - c_in), (0, 0))))    # zero rows: exact
        atts.append(jnp.concatenate([att_src.T, att_dst.T], axis=1))  # (HID, 2)
        biases.append(bias)                                 # (1, HID)
    w_stack = jnp.stack(ws).astype(jnp.bfloat16)            # (L, HID, HID)
    att_stack = jnp.stack(atts).astype(jnp.bfloat16)        # (L, HID, 2)
    b_stack = jnp.stack(biases)                             # (L, 1, HID) f32
    lin1_w = params["lin1_w"].astype(jnp.bfloat16)          # (HID, HID)
    lin1_b = params["lin1_b"]                               # (1, HID) f32
    nc = params["lin2_w"].shape[1]
    lin2_w = jnp.pad(params["lin2_w"], ((0, 0), (0, C_PAD - nc))
                     ).astype(jnp.bfloat16)                 # (HID, C_PAD)
    lin2_b = jnp.pad(params["lin2_b"], ((0, 0), (0, C_PAD - nc)))  # (1, C_PAD)
    return w_stack, att_stack, b_stack, lin1_w, lin1_b, lin2_w, lin2_b


@jax.jit
def gnn_forward(x, adj, pool_onehot, inv_counts, params):
    """Full GNN.forward (eval mode) as a single fused Pallas call."""
    n, c_in = x.shape
    g = pool_onehot.shape[0]
    x_pad = jnp.pad(x, ((0, 0), (0, HID - c_in)))           # channel-pad input

    packed = _pack_params(params)

    flops = NUM_LAYERS * (2 * n * HID * HID     # h @ W
                          + 4 * n * HID         # attention projection
                          + 2 * n * n * HID     # alpha @ h
                          + 8 * n * n)          # softmax elementwise
    flops += 2 * g * n * HID + 2 * g * HID * HID + 2 * g * HID * C_PAD
    operands = (x_pad, adj, pool_onehot, inv_counts) + packed
    bytes_accessed = int(sum(a.size * a.dtype.itemsize for a in operands)
                         + g * C_PAD * 4)

    out_pad = pl.pallas_call(
        gnn_fused_kernel,
        out_shape=jax.ShapeDtypeStruct((g, C_PAD), jnp.float32),
        in_specs=[_VMEM] * 11,
        out_specs=_VMEM,
        cost_estimate=pl.CostEstimate(
            flops=int(flops),
            transcendentals=int(NUM_LAYERS * n * n),
            bytes_accessed=bytes_accessed),
    )(*operands)
    return out_pad[:, :NUM_CLASSES]            # drop lane padding


# ----------------------------- parameter init -----------------------------

def init_gat_params(key, c_in, c_out):
    k_w, k_s, k_d = jax.random.split(key, 3)
    scale_w = (2.0 / (c_in + c_out)) ** 0.5
    w = scale_w * jax.random.normal(k_w, (c_in, c_out), jnp.float32)
    att_src = 0.1 * jax.random.normal(k_s, (1, c_out), jnp.float32)
    att_dst = 0.1 * jax.random.normal(k_d, (1, c_out), jnp.float32)
    bias = jnp.zeros((1, c_out), jnp.float32)
    return (w, att_src, att_dst, bias)


def init_params(key, in_channels=4, num_layers=3, hid=HID,
                num_classes=NUM_CLASSES):
    keys = jax.random.split(key, num_layers + 2)
    params = {
        "conv1": init_gat_params(keys[0], in_channels, hid),
        "convs": [init_gat_params(keys[i + 1], hid, hid)
                  for i in range(num_layers - 1)],
    }
    k1, k2 = keys[num_layers], keys[num_layers + 1]
    params["lin1_w"] = ((2.0 / (2 * hid)) ** 0.5
                        * jax.random.normal(k1, (hid, hid), jnp.float32))
    params["lin1_b"] = jnp.zeros((1, hid), jnp.float32)
    params["lin2_w"] = ((2.0 / (hid + num_classes)) ** 0.5
                        * jax.random.normal(k2, (hid, num_classes), jnp.float32))
    params["lin2_b"] = jnp.zeros((1, num_classes), jnp.float32)
    return params


def build_dense_adj(edge_index, num_nodes):
    """adj[i, j] = 1 iff edge j -> i; self-loops added (GATConv default)."""
    src, dst = edge_index[0], edge_index[1]
    adj = jnp.zeros((num_nodes, num_nodes), jnp.float32)
    adj = adj.at[dst, src].set(1.0)
    diag = jnp.arange(num_nodes)
    adj = adj.at[diag, diag].set(1.0)
    return adj


def build_pool_matrix(batch, num_graphs):
    """0/1 one-hot assignment (G, N) and 1/count (G, 1) for exact mean pooling."""
    onehot = (batch[None, :] == jnp.arange(num_graphs)[:, None]).astype(jnp.float32)
    counts = jnp.maximum(jnp.sum(onehot, axis=1, keepdims=True), 1.0)
    return onehot, 1.0 / counts


# ---------------------------------- main ----------------------------------

if __name__ == "__main__":
    key = jax.random.PRNGKey(0)
    k_param, k_x, k_edge = jax.random.split(key, 3)

    N = 16            # nodes
    E = 40            # directed edges
    IN_C = 4
    NUM_GRAPHS = 2

    params = init_params(k_param, IN_C, num_layers=NUM_LAYERS, hid=HID,
                         num_classes=NUM_CLASSES)

    x = jax.random.normal(k_x, (N, IN_C), jnp.float32)
    edge_index = jax.random.randint(k_edge, (2, E), 0, N, jnp.int32)
    batch = jnp.concatenate([jnp.zeros(N // 2, jnp.int32),
                             jnp.ones(N - N // 2, jnp.int32)])

    adj = build_dense_adj(edge_index, N)
    pool_onehot, inv_counts = build_pool_matrix(batch, NUM_GRAPHS)

    out = gnn_forward(x, adj, pool_onehot, inv_counts, params)
    out = jax.block_until_ready(out)

    assert out.shape == (NUM_GRAPHS, NUM_CLASSES)
    assert out.dtype == jnp.float32
    print("KERNEL_OK")
</pallas_src>

<mosaic_0001>
module attributes {stable_mosaic.version = 11 : i64} {
  func.func @gnn_fused_kernel(%arg0: memref<16x64xf32, #tpu.memory_space<vmem>>, %arg1: memref<16x16xf32, #tpu.memory_space<vmem>>, %arg2: memref<2x16xf32, #tpu.memory_space<vmem>>, %arg3: memref<2x1xf32, #tpu.memory_space<vmem>>, %arg4: memref<3x64x64xbf16, #tpu.memory_space<vmem>>, %arg5: memref<3x64x2xbf16, #tpu.memory_space<vmem>>, %arg6: memref<3x1x64xf32, #tpu.memory_space<vmem>>, %arg7: memref<64x64xbf16, #tpu.memory_space<vmem>>, %arg8: memref<1x64xf32, #tpu.memory_space<vmem>>, %arg9: memref<64x128xbf16, #tpu.memory_space<vmem>>, %arg10: memref<1x128xf32, #tpu.memory_space<vmem>>, %arg11: memref<2x128xf32, #tpu.memory_space<vmem>>) attributes {dimension_semantics = [], scalar_prefetch = 0 : i64, scratch_operands = 0 : i64, tpu.core_type = #tpu.core_type<tc>} {
    %c0 = arith.constant 0 : index
    %c0_0 = arith.constant 0 : index
    %0 = vector.load %arg1[%c0, %c0_0] : memref<16x16xf32, #tpu.memory_space<vmem>>, vector<16x16xf32>
    %c0_1 = arith.constant 0 : index
    %c0_2 = arith.constant 0 : index
    %1 = vector.load %arg0[%c0_1, %c0_2] : memref<16x64xf32, #tpu.memory_space<vmem>>, vector<16x64xf32>
    %c0_3 = arith.constant 0 : index
    %c0_4 = arith.constant 0 : index
    %c0_5 = arith.constant 0 : index
    %2 = vector.load %arg4[%c0_3, %c0_4, %c0_5] : memref<3x64x64xbf16, #tpu.memory_space<vmem>>, vector<1x64x64xbf16>
    %3 = vector.shape_cast %2 : vector<1x64x64xbf16> to vector<64x64xbf16>
    %c0_6 = arith.constant 0 : index
    %c0_7 = arith.constant 0 : index
    %c0_8 = arith.constant 0 : index
    %4 = vector.load %arg5[%c0_6, %c0_7, %c0_8] : memref<3x64x2xbf16, #tpu.memory_space<vmem>>, vector<1x64x2xbf16>
    %5 = vector.shape_cast %4 : vector<1x64x2xbf16> to vector<64x2xbf16>
    %c0_9 = arith.constant 0 : index
    %c0_10 = arith.constant 0 : index
    %c0_11 = arith.constant 0 : index
    %6 = vector.load %arg6[%c0_9, %c0_10, %c0_11] : memref<3x1x64xf32, #tpu.memory_space<vmem>>, vector<1x1x64xf32>
    %7 = vector.shape_cast %6 : vector<1x1x64xf32> to vector<1x64xf32>
    %8 = arith.truncf %1 : vector<16x64xf32> to vector<16x64xbf16>
    %cst = arith.constant dense<0.000000e+00> : vector<16x64xf32>
    %9 = tpu.matmul %8, %3, %cst {dimension_numbers = #tpu.dot_dimension_numbers<[1], [0], [0], [1], [0, 0, 1, 1], [], []>} : vector<16x64xbf16>, vector<64x64xbf16>, vector<16x64xf32> -> vector<16x64xf32>
    %10 = arith.truncf %9 : vector<16x64xf32> to vector<16x64xbf16>
    %cst_12 = arith.constant dense<0.000000e+00> : vector<16x2xf32>
    %11 = tpu.matmul %10, %5, %cst_12 {dimension_numbers = #tpu.dot_dimension_numbers<[1], [0], [0], [1], [0, 0, 1, 1], [], []>} : vector<16x64xbf16>, vector<64x2xbf16>, vector<16x2xf32> -> vector<16x2xf32>
    %12 = vector.extract_strided_slice %11 {offsets = [0, 0], sizes = [16, 1], strides = [1, 1]} : vector<16x2xf32> to vector<16x1xf32>
    %13 = vector.extract_strided_slice %11 {offsets = [0, 1], sizes = [16, 1], strides = [1, 1]} : vector<16x2xf32> to vector<16x1xf32>
    %14 = tpu.transpose %12, [1, 0] : vector<16x1xf32> -> vector<1x16xf32>
    %15 = vector.broadcast %13 : vector<16x1xf32> to vector<16x16xf32>
    %16 = vector.broadcast %14 : vector<1x16xf32> to vector<16x16xf32>
    %17 = arith.addf %15, %16 : vector<16x16xf32>
    %cst_13 = arith.constant 0.000000e+00 : f32
    %18 = vector.broadcast %cst_13 : f32 to vector<16x16xf32>
    %19 = arith.cmpf ogt, %17, %18 : vector<16x16xf32>
    %cst_14 = arith.constant 2.000000e-01 : f32
    %20 = vector.broadcast %cst_14 : f32 to vector<16x16xf32>
    %21 = arith.mulf %20, %17 : vector<16x16xf32>
    %22 = arith.select %19, %17, %21 : vector<16x16xi1>, vector<16x16xf32>
    %cst_15 = arith.constant 0.000000e+00 : f32
    %23 = vector.broadcast %cst_15 : f32 to vector<16x16xf32>
    %24 = arith.cmpf ogt, %0, %23 : vector<16x16xf32>
    %cst_16 = arith.constant -1.000000e+30 : f32
    %25 = vector.broadcast %cst_16 : f32 to vector<16x16xf32>
    %26 = arith.select %24, %22, %25 : vector<16x16xi1>, vector<16x16xf32>
    %cst_17 = arith.constant dense<0xFF800000> : vector<16xf32>
    %27 = vector.multi_reduction <maximumf>, %26, %cst_17 [1] : vector<16x16xf32> to vector<16xf32>
    %28 = vector.shape_cast %27 : vector<16xf32> to vector<16x1xf32>
    %29 = vector.broadcast %28 : vector<16x1xf32> to vector<16x16xf32>
    %30 = arith.subf %26, %29 : vector<16x16xf32>
    %31 = math.exp %30 : vector<16x16xf32>
    %cst_18 = arith.constant dense<0.000000e+00> : vector<16xf32>
    %32 = vector.multi_reduction <add>, %31, %cst_18 [1] : vector<16x16xf32> to vector<16xf32>
    %33 = vector.shape_cast %32 : vector<16xf32> to vector<16x1xf32>
    %34 = tpu.reciprocal %33 {approx = true} : vector<16x1xf32> -> vector<16x1xf32>
    %35 = vector.broadcast %34 : vector<16x1xf32> to vector<16x16xf32>
    %36 = arith.mulf %31, %35 : vector<16x16xf32>
    %37 = arith.truncf %36 : vector<16x16xf32> to vector<16x16xbf16>
    %cst_19 = arith.constant dense<0.000000e+00> : vector<16x64xf32>
    %38 = tpu.matmul %37, %10, %cst_19 {dimension_numbers = #tpu.dot_dimension_numbers<[1], [0], [0], [1], [0, 0, 1, 1], [], []>} : vector<16x16xbf16>, vector<16x64xbf16>, vector<16x64xf32> -> vector<16x64xf32>
    %39 = vector.broadcast %7 : vector<1x64xf32> to vector<16x64xf32>
    %40 = arith.addf %38, %39 : vector<16x64xf32>
    %cst_20 = arith.constant 0.000000e+00 : f32
    %41 = vector.broadcast %cst_20 : f32 to vector<16x64xf32>
    %42 = arith.maximumf %40, %41 : vector<16x64xf32>
    %c1 = arith.constant 1 : index
    %c0_21 = arith.constant 0 : index
    %c0_22 = arith.constant 0 : index
    %43 = vector.load %arg4[%c1, %c0_21, %c0_22] : memref<3x64x64xbf16, #tpu.memory_space<vmem>>, vector<1x64x64xbf16>
    %44 = vector.shape_cast %43 : vector<1x64x64xbf16> to vector<64x64xbf16>
    %c1_23 = arith.constant 1 : index
    %c0_24 = arith.constant 0 : index
    %c0_25 = arith.constant 0 : index
    %45 = vector.load %arg5[%c1_23, %c0_24, %c0_25] : memref<3x64x2xbf16, #tpu.memory_space<vmem>>, vector<1x64x2xbf16>
    %46 = vector.shape_cast %45 : vector<1x64x2xbf16> to vector<64x2xbf16>
    %c1_26 = arith.constant 1 : index
    %c0_27 = arith.constant 0 : index
    %c0_28 = arith.constant 0 : index
    %47 = vector.load %arg6[%c1_26, %c0_27, %c0_28] : memref<3x1x64xf32, #tpu.memory_space<vmem>>, vector<1x1x64xf32>
    %48 = vector.shape_cast %47 : vector<1x1x64xf32> to vector<1x64xf32>
    %49 = arith.truncf %42 : vector<16x64xf32> to vector<16x64xbf16>
    %cst_29 = arith.constant dense<0.000000e+00> : vector<16x64xf32>
    %50 = tpu.matmul %49, %44, %cst_29 {dimension_numbers = #tpu.dot_dimension_numbers<[1], [0], [0], [1], [0, 0, 1, 1], [], []>} : vector<16x64xbf16>, vector<64x64xbf16>, vector<16x64xf32> -> vector<16x64xf32>
    %51 = arith.truncf %50 : vector<16x64xf32> to vector<16x64xbf16>
    %cst_30 = arith.constant dense<0.000000e+00> : vector<16x2xf32>
    %52 = tpu.matmul %51, %46, %cst_30 {dimension_numbers = #tpu.dot_dimension_numbers<[1], [0], [0], [1], [0, 0, 1, 1], [], []>} : vector<16x64xbf16>, vector<64x2xbf16>, vector<16x2xf32> -> vector<16x2xf32>
    %53 = vector.extract_strided_slice %52 {offsets = [0, 0], sizes = [16, 1], strides = [1, 1]} : vector<16x2xf32> to vector<16x1xf32>
    %54 = vector.extract_strided_slice %52 {offsets = [0, 1], sizes = [16, 1], strides = [1, 1]} : vector<16x2xf32> to vector<16x1xf32>
    %55 = tpu.transpose %53, [1, 0] : vector<16x1xf32> -> vector<1x16xf32>
    %56 = vector.broadcast %54 : vector<16x1xf32> to vector<16x16xf32>
    %57 = vector.broadcast %55 : vector<1x16xf32> to vector<16x16xf32>
    %58 = arith.addf %56, %57 : vector<16x16xf32>
    %cst_31 = arith.constant 0.000000e+00 : f32
    %59 = vector.broadcast %cst_31 : f32 to vector<16x16xf32>
    %60 = arith.cmpf ogt, %58, %59 : vector<16x16xf32>
    %cst_32 = arith.constant 2.000000e-01 : f32
    %61 = vector.broadcast %cst_32 : f32 to vector<16x16xf32>
    %62 = arith.mulf %61, %58 : vector<16x16xf32>
    %63 = arith.select %60, %58, %62 : vector<16x16xi1>, vector<16x16xf32>
    %cst_33 = arith.constant 0.000000e+00 : f32
    %64 = vector.broadcast %cst_33 : f32 to vector<16x16xf32>
    %65 = arith.cmpf ogt, %0, %64 : vector<16x16xf32>
    %cst_34 = arith.constant -1.000000e+30 : f32
    %66 = vector.broadcast %cst_34 : f32 to vector<16x16xf32>
    %67 = arith.select %65, %63, %66 : vector<16x16xi1>, vector<16x16xf32>
    %cst_35 = arith.constant dense<0xFF800000> : vector<16xf32>
    %68 = vector.multi_reduction <maximumf>, %67, %cst_35 [1] : vector<16x16xf32> to vector<16xf32>
    %69 = vector.shape_cast %68 : vector<16xf32> to vector<16x1xf32>
    %70 = vector.broadcast %69 : vector<16x1xf32> to vector<16x16xf32>
    %71 = arith.subf %67, %70 : vector<16x16xf32>
    %72 = math.exp %71 : vector<16x16xf32>
    %cst_36 = arith.constant dense<0.000000e+00> : vector<16xf32>
    %73 = vector.multi_reduction <add>, %72, %cst_36 [1] : vector<16x16xf32> to vector<16xf32>
    %74 = vector.shape_cast %73 : vector<16xf32> to vector<16x1xf32>
    %75 = tpu.reciprocal %74 {approx = true} : vector<16x1xf32> -> vector<16x1xf32>
    %76 = vector.broadcast %75 : vector<16x1xf32> to vector<16x16xf32>
    %77 = arith.mulf %72, %76 : vector<16x16xf32>
    %78 = arith.truncf %77 : vector<16x16xf32> to vector<16x16xbf16>
    %cst_37 = arith.constant dense<0.000000e+00> : vector<16x64xf32>
    %79 = tpu.matmul %78, %51, %cst_37 {dimension_numbers = #tpu.dot_dimension_numbers<[1], [0], [0], [1], [0, 0, 1, 1], [], []>} : vector<16x16xbf16>, vector<16x64xbf16>, vector<16x64xf32> -> vector<16x64xf32>
    %80 = vector.broadcast %48 : vector<1x64xf32> to vector<16x64xf32>
    %81 = arith.addf %79, %80 : vector<16x64xf32>
    %cst_38 = arith.constant 0.000000e+00 : f32
    %82 = vector.broadcast %cst_38 : f32 to vector<16x64xf32>
    %83 = arith.maximumf %81, %82 : vector<16x64xf32>
    %c2 = arith.constant 2 : index
    %c0_39 = arith.constant 0 : index
    %c0_40 = arith.constant 0 : index
    %84 = vector.load %arg4[%c2, %c0_39, %c0_40] : memref<3x64x64xbf16, #tpu.memory_space<vmem>>, vector<1x64x64xbf16>
    %85 = vector.shape_cast %84 : vector<1x64x64xbf16> to vector<64x64xbf16>
    %c2_41 = arith.constant 2 : index
    %c0_42 = arith.constant 0 : index
    %c0_43 = arith.constant 0 : index
    %86 = vector.load %arg5[%c2_41, %c0_42, %c0_43] : memref<3x64x2xbf16, #tpu.memory_space<vmem>>, vector<1x64x2xbf16>
    %87 = vector.shape_cast %86 : vector<1x64x2xbf16> to vector<64x2xbf16>
    %c2_44 = arith.constant 2 : index
    %c0_45 = arith.constant 0 : index
    %c0_46 = arith.constant 0 : index
    %88 = vector.load %arg6[%c2_44, %c0_45, %c0_46] : memref<3x1x64xf32, #tpu.memory_space<vmem>>, vector<1x1x64xf32>
    %89 = vector.shape_cast %88 : vector<1x1x64xf32> to vector<1x64xf32>
    %90 = arith.truncf %83 : vector<16x64xf32> to vector<16x64xbf16>
    %cst_47 = arith.constant dense<0.000000e+00> : vector<16x64xf32>
    %91 = tpu.matmul %90, %85, %cst_47 {dimension_numbers = #tpu.dot_dimension_numbers<[1], [0], [0], [1], [0, 0, 1, 1], [], []>} : vector<16x64xbf16>, vector<64x64xbf16>, vector<16x64xf32> -> vector<16x64xf32>
    %92 = arith.truncf %91 : vector<16x64xf32> to vector<16x64xbf16>
    %cst_48 = arith.constant dense<0.000000e+00> : vector<16x2xf32>
    %93 = tpu.matmul %92, %87, %cst_48 {dimension_numbers = #tpu.dot_dimension_numbers<[1], [0], [0], [1], [0, 0, 1, 1], [], []>} : vector<16x64xbf16>, vector<64x2xbf16>, vector<16x2xf32> -> vector<16x2xf32>
    %94 = vector.extract_strided_slice %93 {offsets = [0, 0], sizes = [16, 1], strides = [1, 1]} : vector<16x2xf32> to vector<16x1xf32>
    %95 = vector.extract_strided_slice %93 {offsets = [0, 1], sizes = [16, 1], strides = [1, 1]} : vector<16x2xf32> to vector<16x1xf32>
    %96 = tpu.transpose %94, [1, 0] : vector<16x1xf32> -> vector<1x16xf32>
    %97 = vector.broadcast %95 : vector<16x1xf32> to vector<16x16xf32>
    %98 = vector.broadcast %96 : vector<1x16xf32> to vector<16x16xf32>
    %99 = arith.addf %97, %98 : vector<16x16xf32>
    %cst_49 = arith.constant 0.000000e+00 : f32
    %100 = vector.broadcast %cst_49 : f32 to vector<16x16xf32>
    %101 = arith.cmpf ogt, %99, %100 : vector<16x16xf32>
    %cst_50 = arith.constant 2.000000e-01 : f32
    %102 = vector.broadcast %cst_50 : f32 to vector<16x16xf32>
    %103 = arith.mulf %102, %99 : vector<16x16xf32>
    %104 = arith.select %101, %99, %103 : vector<16x16xi1>, vector<16x16xf32>
    %cst_51 = arith.constant 0.000000e+00 : f32
    %105 = vector.broadcast %cst_51 : f32 to vector<16x16xf32>
    %106 = arith.cmpf ogt, %0, %105 : vector<16x16xf32>
    %cst_52 = arith.constant -1.000000e+30 : f32
    %107 = vector.broadcast %cst_52 : f32 to vector<16x16xf32>
    %108 = arith.select %106, %104, %107 : vector<16x16xi1>, vector<16x16xf32>
    %cst_53 = arith.constant dense<0xFF800000> : vector<16xf32>
    %109 = vector.multi_reduction <maximumf>, %108, %cst_53 [1] : vector<16x16xf32> to vector<16xf32>
    %110 = vector.shape_cast %109 : vector<16xf32> to vector<16x1xf32>
    %111 = vector.broadcast %110 : vector<16x1xf32> to vector<16x16xf32>
    %112 = arith.subf %108, %111 : vector<16x16xf32>
    %113 = math.exp %112 : vector<16x16xf32>
    %cst_54 = arith.constant dense<0.000000e+00> : vector<16xf32>
    %114 = vector.multi_reduction <add>, %113, %cst_54 [1] : vector<16x16xf32> to vector<16xf32>
    %115 = vector.shape_cast %114 : vector<16xf32> to vector<16x1xf32>
    %116 = tpu.reciprocal %115 {approx = true} : vector<16x1xf32> -> vector<16x1xf32>
    %117 = vector.broadcast %116 : vector<16x1xf32> to vector<16x16xf32>
    %118 = arith.mulf %113, %117 : vector<16x16xf32>
    %119 = arith.truncf %118 : vector<16x16xf32> to vector<16x16xbf16>
    %cst_55 = arith.constant dense<0.000000e+00> : vector<16x64xf32>
    %120 = tpu.matmul %119, %92, %cst_55 {dimension_numbers = #tpu.dot_dimension_numbers<[1], [0], [0], [1], [0, 0, 1, 1], [], []>} : vector<16x16xbf16>, vector<16x64xbf16>, vector<16x64xf32> -> vector<16x64xf32>
    %121 = vector.broadcast %89 : vector<1x64xf32> to vector<16x64xf32>
    %122 = arith.addf %120, %121 : vector<16x64xf32>
    %cst_56 = arith.constant 0.000000e+00 : f32
    %123 = vector.broadcast %cst_56 : f32 to vector<16x64xf32>
    %124 = arith.maximumf %122, %123 : vector<16x64xf32>
    %c0_57 = arith.constant 0 : index
    %c0_58 = arith.constant 0 : index
    %125 = vector.load %arg2[%c0_57, %c0_58] : memref<2x16xf32, #tpu.memory_space<vmem>>, vector<2x16xf32>
    %126 = arith.truncf %125 : vector<2x16xf32> to vector<2x16xbf16>
    %127 = arith.truncf %124 : vector<16x64xf32> to vector<16x64xbf16>
    %cst_59 = arith.constant dense<0.000000e+00> : vector<2x64xf32>
    %128 = tpu.matmul %126, %127, %cst_59 {dimension_numbers = #tpu.dot_dimension_numbers<[1], [0], [0], [1], [0, 0, 1, 1], [], []>} : vector<2x16xbf16>, vector<16x64xbf16>, vector<2x64xf32> -> vector<2x64xf32>
    %c0_60 = arith.constant 0 : index
    %c0_61 = arith.constant 0 : index
    %129 = vector.load %arg3[%c0_60, %c0_61] : memref<2x1xf32, #tpu.memory_space<vmem>>, vector<2x1xf32>
    %130 = vector.broadcast %129 : vector<2x1xf32> to vector<2x64xf32>
    %131 = arith.mulf %128, %130 : vector<2x64xf32>
    %132 = arith.truncf %131 : vector<2x64xf32> to vector<2x64xbf16>
    %c0_62 = arith.constant 0 : index
    %c0_63 = arith.constant 0 : index
    %133 = vector.load %arg7[%c0_62, %c0_63] : memref<64x64xbf16, #tpu.memory_space<vmem>>, vector<64x64xbf16>
    %cst_64 = arith.constant dense<0.000000e+00> : vector<2x64xf32>
    %134 = tpu.matmul %132, %133, %cst_64 {dimension_numbers = #tpu.dot_dimension_numbers<[1], [0], [0], [1], [0, 0, 1, 1], [], []>} : vector<2x64xbf16>, vector<64x64xbf16>, vector<2x64xf32> -> vector<2x64xf32>
    %c0_65 = arith.constant 0 : index
    %c0_66 = arith.constant 0 : index
    %135 = vector.load %arg8[%c0_65, %c0_66] : memref<1x64xf32, #tpu.memory_space<vmem>>, vector<1x64xf32>
    %136 = vector.broadcast %135 : vector<1x64xf32> to vector<2x64xf32>
    %137 = arith.addf %134, %136 : vector<2x64xf32>
    %cst_67 = arith.constant 0.000000e+00 : f32
    %138 = vector.broadcast %cst_67 : f32 to vector<2x64xf32>
    %139 = arith.maximumf %137, %138 : vector<2x64xf32>
    %140 = arith.truncf %139 : vector<2x64xf32> to vector<2x64xbf16>
    %c0_68 = arith.constant 0 : index
    %c0_69 = arith.constant 0 : index
    %141 = vector.load %arg9[%c0_68, %c0_69] : memref<64x128xbf16, #tpu.memory_space<vmem>>, vector<64x128xbf16>
    %cst_70 = arith.constant dense<0.000000e+00> : vector<2x128xf32>
    %142 = tpu.matmul %140, %141, %cst_70 {dimension_numbers = #tpu.dot_dimension_numbers<[1], [0], [0], [1], [0, 0, 1, 1], [], []>} : vector<2x64xbf16>, vector<64x128xbf16>, vector<2x128xf32> -> vector<2x128xf32>
    %c0_71 = arith.constant 0 : index
    %c0_72 = arith.constant 0 : index
    %143 = vector.load %arg10[%c0_71, %c0_72] : memref<1x128xf32, #tpu.memory_space<vmem>>, vector<1x128xf32>
    %144 = vector.broadcast %143 : vector<1x128xf32> to vector<2x128xf32>
    %145 = arith.addf %142, %144 : vector<2x128xf32>
    %c0_73 = arith.constant 0 : index
    %c0_74 = arith.constant 0 : index
    %146 = vector.load %arg11[%c0_73, %c0_74] : memref<2x128xf32, #tpu.memory_space<vmem>>, vector<2x128xf32>
    tpu.vector_store %arg11[%c0_73, %c0_74], %145 {strides = array<i32>} : memref<2x128xf32, #tpu.memory_space<vmem>>, vector<2x128xf32>,
    return
  }
}

</mosaic_0001>

<bundles_post_ra>
// kernel: gnn_forward.1
= control target key start
LH: loop header
LB: loop body
LE: loop exit
PB: predicated region body
PF: predicated region fallthrough
CT: control target
= control target key end

     0   :  { %s1307_s0 = inlined_call_operand.vmem [shape: f32[16,64], index: 0, kind: input, shape index: {}]   ;;  %s1308_s1 = inlined_call_operand.vmem [shape: f32[16,16], index: 1, kind: input, shape index: {}]   ;;  %s1309_s2 = inlined_call_operand.vmem [shape: f32[2,16], index: 2, kind: input, shape index: {}]   ;;  %s1310_s3 = inlined_call_operand.vmem [shape: f32[2,1], index: 3, kind: input, shape index: {}]   ;;  %s1311_s4 = inlined_call_operand.vmem [shape: bf16[3,64,64], index: 4, kind: input, shape index: {}]   ;;  %s1312_s5 = inlined_call_operand.vmem [shape: bf16[3,64,2], index: 5, kind: input, shape index: {}]   ;;  %s1313_s6 = inlined_call_operand.vmem [shape: f32[3,1,64], index: 6, kind: input, shape index: {}]   ;;  %s1314_s7 = inlined_call_operand.vmem [shape: bf16[64,64], index: 7, kind: input, shape index: {}]   ;;  %s1315_s8 = inlined_call_operand.vmem [shape: f32[1,64], index: 8, kind: input, shape index: {}]   ;;  %s1316_s9 = inlined_call_operand.vmem [shape: bf16[64,128], index: 9, kind: input, shape index: {}]   ;;  %s1317_s10 = inlined_call_operand.vmem [shape: f32[1,128], index: 10, kind: input, shape index: {}]   ;;  %s1318_s11 = inlined_call_operand.hbm [shape: f32[2,128], index: 11, kind: output, shape index: {}]  }
   0x1   :  { %v978_v0 = vld [vmem:[%s1311_s4 + $0x18] sm:$0xff]  ;;  %v977_v1 = vld [vmem:[%s1311_s4 + $0x10] sm:$0xff] }
   0x2   :  { %94 = vmatpush.bf16.msra.mxu0 %v978_v0  ;;  %v982_v2 = vld [vmem:[%s1312_s5 + $0x18] sm:$0xff] }
   0x3   :  { %136 = vmatpush.bf16.msra.mxu1 %v982_v2 }
   0x4   :  { %16 = vsyncpa [#allocation3], 0  ;;  %v976_v3 = vld [vmem:[%s1311_s4 + $0x8] sm:$0xff]  ;;  %v975_v4 = vld [vmem:[%s1311_s4] sm:$0xff]  ;;  %vm86_vm0 = vcmask 523264   ;;  %v1070_v11 = vmov 1  }
   0x5   :  { %v42_v5 = vld [vmem:[%s1307_s0] sm:$0xff]  ;;  %v43_v6 = vld [vmem:[%s1307_s0 + $0x8] sm:$0xff]  ;;  %v981_v8 = vld [vmem:[%s1312_s5 + $0x10] sm:$0xff]  ;;  %1011 = vset.pattern.permute.xlu0 %v1070_v11  ;;  %1012 = vset.pattern.permute.xlu2 %v1070_v11  ;;  %vm201_vm3 = vcmask 130048   ;;  %s1072_s14 = smov [#allocation2]   ;;  %s792_s16 = sshll.u32 %s1318_s11, 4  ;;  %s793_s16 = int_to_ptr.hbm [resolvable:$true] %s792_s16 }
   0x6   :  { %95 = vmatpush.bf16.msra.mxu0 %v977_v1  ;;  %v61_v7 = vpack.c.bf16 %v43_v6, %v42_v5  ;;  %v980_v9 = vld [vmem:[%s1312_s5 + $0x8] sm:$0xff]  ;;  %v979_v10 = vld [vmem:[%s1312_s5] sm:$0xff]  ;;  %v986_v50 = vld [vmem:[%s1311_s4 + $0x38] sm:$0xff] }
   0x7   :  { %137 = vmatpush.bf16.msra.mxu1 %v981_v8  ;;  %v1168_v21 = vld [vmem:[%s1308_s1] sm:$0xff]  ;;  %v1176_v28 = vld [vmem:[%s1308_s1 + $0x8] sm:$0xff]  ;;  %299 = vmatpush.bf16.msra.mxu3 %v986_v50  ;;  %v985_v51 = vld [vmem:[%s1311_s4 + $0x30] sm:$0xff] }
   0x8   :  { %vm197_vm2 = vcmp.gt.f32.partialorder %v1168_v21, 0.0  ;;  %vm198_vm5 = vcmp.gt.f32.partialorder %v1176_v28, 0.0  ;;  %v984_v52 = vld [vmem:[%s1311_s4 + $0x28] sm:$0xff]  ;;  %v983_v53 = vld [vmem:[%s1311_s4 + $0x20] sm:$0xff]  ;;  %v990_v54 = vld [vmem:[%s1312_s5 + $0x38] sm:$0xff] }
   0x9   :  { %v1015_v56 = vld [vmem:[%s1313_s6] ss:$0 sm:$0xff]  ;;  %v989_v63 = vld [vmem:[%s1312_s5 + $0x30] sm:$0xff]  ;;  %v988_v0 = vld [vmem:[%s1312_s5 + $0x28] sm:$0xff] }
   0xa   :  { %96 = vmatpush.bf16.msra.mxu0 %v976_v3  ;;  %v987_v1 = vld [vmem:[%s1312_s5 + $0x20] sm:$0xff] }
   0xb   :  { %138 = vmatpush.bf16.msra.mxu1 %v980_v9  ;;  %300 = vmatpush.bf16.msra.mxu3 %v985_v51 }
   0xe   :  { %97 = vmatpush.bf16.msra.mxu0 %v975_v4 }
   0xf   :  { %139 = vmatpush.bf16.msra.mxu1 %v979_v10  ;;  %301 = vmatpush.bf16.msra.mxu3 %v984_v52 }
  0x11   :  { %817 = vmatmul.msk.bf16.vlgmr.msra.gmra.mxu0 %vm86_vm0, %v61_v7 }
  0x13   :  { %302 = vmatpush.bf16.msra.mxu3 %v983_v53  ;;  %v997_v53 = vld [vmem:[%s1312_s5 + $0x50] sm:$0xff] }
  0x8e   :  { %v99_v12 = vpop.f32.mrf.mxu0 }
  0x96   :  { %v101_v13 = vpop.f32.mrf.mxu0 }
  0x97   :  { %v104_v14 = vpack.c.bf16 %v101_v13, %v99_v12 }
  0x99   :  { %834 = vmatmul.msk.bf16.vlgmr.msra.gmra.mxu1 %vm86_vm0, %v104_v14  ;;  %238 = vmatpush.bf16.msra.mxu2 %v104_v14 }
  0x9d   :  { %341 = vmatpush.bf16.msrb.mxu2 %v990_v54  ;;  %v996_v54 = vld [vmem:[%s1312_s5 + $0x48] sm:$0xff] }
  0xa1   :  { %342 = vmatpush.bf16.msrb.mxu2 %v989_v63 }
  0xa5   :  { %343 = vmatpush.bf16.msrb.mxu2 %v988_v0 }
  0xa9   :  { %344 = vmatpush.bf16.msrb.mxu2 %v987_v1 }
 0x116   :  { %v141_v15 = vpop.f32.mrf.mxu1 }
 0x117   :  { %146 = vxpose.xlu1.b32.start [1/2] (short) (narrow) %v141_v15, 8  ;;  %180 = vperm.xlu0 %1011, %v141_v15  }
 0x11e   :  { %v143_v16 = vpop.f32.mrf.mxu1 }
 0x11f   :  { %147 = vxpose.xlu1.b32.end [2/2] (short) (narrow) %v143_v16, 8  ;;  %185 = vperm.xlu0 %1011, %v143_v16  }
 0x189   :  { %v181_v17 = vpop.permute.xlu0 %180 }
 0x191   :  { %v186_v20 = vpop.permute.xlu0 %185 }
 0x1bb   :  { %v162_v18 = vpop.trf.xlu1 }
 0x1bc   :  { %v188_v19 = vperm.slane %v162_v18, 0 }
 0x1be   :  { %v189_v22 = vadd.f32 %v188_v19, %v181_v17  ;;  %v190_v23 = vadd.f32 %v188_v19, %v186_v20 }
 0x1c0   :  { %vm191_vm1 = vcmp.gt.f32.partialorder %v189_v22, 0.0  ;;  %v193_v24 = vmul.f32 0.2, %v189_v22  ;;  %v194_v26 = vmul.f32 0.2, %v190_v23  ;;  %vm192_vm4 = vcmp.gt.f32.partialorder %v190_v23, 0.0 }
 0x1c2   :  { %v195_v25 = vsel %vm191_vm1, %v189_v22, %v193_v24  ;;  %v196_v30 = vsel %vm192_vm4, %v190_v23, %v194_v26 }
 0x1c3   :  { %v199_v27 = vsel %vm197_vm2, %v195_v25, -1e+30  ;;  %v200_v31 = vsel %vm198_vm5, %v196_v30, -1e+30 }
 0x1c4   :  { %v202_v29 = vsel %vm201_vm3, %v199_v27, -inf  ;;  %v205_v32 = vsel %vm201_vm3, %v200_v31, -inf }
 0x1c5   :  { %203 = vmax.xlane.f32.xlu2 %v202_v29 }
 0x1cd   :  { %206 = vmax.xlane.f32.xlu2 %v205_v32 }
 0x238   :  { %v204_v33 = vpop.xlane.xlu2 %203 }
 0x239   :  { %v208_v34 = vsub.f32 %v199_v27, %v204_v33 }
 0x23b   :  { %v210_v35 = vmul.f32 1.442695, %v208_v34 }
 0x23d   :  { %1020 = vpow2.f32 %v210_v35 }
 0x240   :  { %v207_v36 = vpop.xlane.xlu2 %206 }
 0x241   :  { %v209_v37 = vsub.f32 %v200_v31, %v207_v36 }
 0x243   :  { %v1021_v38 = vpop.eup %1020  ;;  %v212_v39 = vmul.f32 1.442695, %v209_v37 }
 0x244   :  { %v214_v40 = vsel %vm201_vm3, %v1021_v38, 0.0 }
 0x245   :  { %1022 = vpow2.f32 %v212_v39  ;;  %215 = vadd.xlane.f32.xlu0 %v214_v40  ;;  %v994_v40 = vld [vmem:[%s1311_s4 + $0x58] sm:$0xff] }
 0x246   :  { %501 = vmatpush.bf16.msrb.mxu1 %v994_v40  ;;  %v651_v40 = vld [vmem:[%s1309_s2] sm:$0x3] }
 0x24b   :  { %v1023_v41 = vpop.eup %1022 }
 0x24c   :  { %v217_v42 = vsel %vm201_vm3, %v1023_v41, 0.0 }
 0x24d   :  { %218 = vadd.xlane.f32.xlu1 %v217_v42  ;;  %v992_v42 = vld [vmem:[%s1311_s4 + $0x48] sm:$0xff] }
 0x2b8   :  { %v216_v43 = vpop.xlane.xlu0 %215 }
 0x2b9   :  { %1024 = vrcp.f32 %v216_v43  ;;  %v991_v43 = vld [vmem:[%s1311_s4 + $0x40] sm:$0xff] }
 0x2bf   :  { %v1025_v45 = vpop.eup %1024 }
 0x2c0   :  { %v219_v44 = vpop.xlane.xlu1 %218  ;;  %v222_v47 = vmul.f32 %v1025_v45, %v1021_v38 }
 0x2c1   :  { %1026 = vrcp.f32 %v219_v44  ;;  %v998_v44 = vld [vmem:[%s1312_s5 + $0x58] sm:$0xff] }
 0x2c2   :  { %543 = vmatpush.bf16.msrb.mxu3 %v998_v44  ;;  %v1006_v44 = vld [vmem:[%s1316_s9 + $0x18] sm:$0xff] }
 0x2c6   :  { %544 = vmatpush.bf16.msrb.mxu3 %v997_v53  ;;  %v1018_v53 = vld [vmem:[%s1315_s8] ss:$0 sm:$0xff] }
 0x2c7   :  { %v1027_v46 = vpop.eup %1026 }
 0x2c8   :  { %v223_v48 = vmul.f32 %v1027_v46, %v1023_v41  ;;  %v993_v41 = vld [vmem:[%s1311_s4 + $0x50] sm:$0xff]  ;;  %v1016_v46 = vld [vmem:[%s1313_s6 + $0x1] ss:$0 sm:$0xff] }
 0x2c9   :  { %502 = vmatpush.bf16.msrb.mxu1 %v993_v41 }
 0x2ca   :  { %v224_v49 = vpack.c.bf16 %v223_v48, %v222_v47  ;;  %545 = vmatpush.bf16.msrb.mxu3 %v996_v54 }
 0x2cc   :  { %835 = vmatmul.msk.bf16.vlgmr.msra.gmra.mxu2 %vm201_vm3, %v224_v49 }
 0x2cd   :  { %503 = vmatpush.bf16.msrb.mxu1 %v992_v42  ;;  %v652_v42 = vpack.c.bf16 %v651_v40, %v651_v40 }
 0x2d1   :  { %504 = vmatpush.bf16.msrb.mxu1 %v991_v43  ;;  %v999_v43 = vld [vmem:[%s1314_s7] sm:$0xff] }
 0x34f   :  { %v240_v55 = vpop.f32.mrf.mxu2 }
 0x350   :  { %v241_v57 = vadd.f32 %v1015_v56, %v240_v55  ;;  %v995_v55 = vld [vmem:[%s1312_s5 + $0x40] sm:$0xff]  ;;  %s790_s5 = sshll.u32 %s1072_s14, 4  ;;  %s791_s5 = int_to_ptr.vmem [resolvable:$true] %s790_s5 }
 0x351   :  { %546 = vmatpush.bf16.msrb.mxu3 %v995_v55 }
 0x352   :  { %v245_v60 = vmax.f32 %v241_v57, 0.0 }
 0x357   :  { %v242_v58 = vpop.f32.mrf.mxu2 }
 0x358   :  { %v243_v59 = vadd.f32 %v1015_v56, %v242_v58 }
 0x35a   :  { %v246_v61 = vmax.f32 %v243_v59, 0.0 }
 0x35c   :  { %v267_v62 = vpack.c.bf16 %v246_v61, %v245_v60 }
 0x35e   :  { %869 = vmatmul.msk.bf16.vlgmr.msra.gmra.mxu3 %vm86_vm0, %v267_v62 }
 0x35f   :  { %775 = vmatpush.bf16.msra.mxu3 %v1006_v44 }
 0x3e1   :  { %v304_v2 = vpop.f32.mrf.mxu3 }
 0x3e9   :  { %v306_v3 = vpop.f32.mrf.mxu3 }
 0x3ea   :  { %v309_v4 = vpack.c.bf16 %v306_v3, %v304_v2 }
 0x3ec   :  { %886 = vmatmul.msk.bf16.vlgmr.msrb.gmra.mxu2 %vm86_vm0, %v309_v4  ;;  %440 = vmatpush.bf16.msrb.mxu0 %v309_v4 }
 0x46f   :  { %v346_v5 = vpop.f32.mrf.mxu2 }
 0x470   :  { %385 = vperm.xlu2 %1012, %v346_v5  }
 0x477   :  { %v348_v6 = vpop.f32.mrf.mxu2 }
 0x478   :  { %390 = vperm.xlu2 %1012, %v348_v6  }
 0x49e   :  { %351 = vxpose.xlu2.b32.start [1/2] (short) (narrow) %v346_v5, 8 }
 0x4a6   :  { %352 = vxpose.xlu2.b32.end [2/2] (short) (narrow) %v348_v6, 8 }
 0x4ca   :  { %v386_v7 = vpop.permute.xlu2 %385 }
 0x4d2   :  { %v391_v8 = vpop.permute.xlu2 %390 }
 0x537   :  { %v367_v9 = vpop.trf.xlu2 }
 0x538   :  { %v393_v10 = vperm.slane %v367_v9, 0 }
 0x53a   :  { %v394_v11 = vadd.f32 %v393_v10, %v386_v7  ;;  %v395_v12 = vadd.f32 %v393_v10, %v391_v8 }
 0x53c   :  { %vm396_vm6 = vcmp.gt.f32.partialorder %v394_v11, 0.0  ;;  %v398_v13 = vmul.f32 0.2, %v394_v11  ;;  %v399_v15 = vmul.f32 0.2, %v395_v12  ;;  %vm397_vm7 = vcmp.gt.f32.partialorder %v395_v12, 0.0 }
 0x53e   :  { %v400_v14 = vsel %vm396_vm6, %v394_v11, %v398_v13  ;;  %v401_v18 = vsel %vm397_vm7, %v395_v12, %v399_v15 }
 0x53f   :  { %v402_v16 = vsel %vm197_vm2, %v400_v14, -1e+30  ;;  %v403_v19 = vsel %vm198_vm5, %v401_v18, -1e+30 }
 0x540   :  { %v404_v17 = vsel %vm201_vm3, %v402_v16, -inf  ;;  %v407_v20 = vsel %vm201_vm3, %v403_v19, -inf }
 0x541   :  { %405 = vmax.xlane.f32.xlu0 %v404_v17 }
 0x549   :  { %408 = vmax.xlane.f32.xlu0 %v407_v20 }
 0x5b4   :  { %v406_v22 = vpop.xlane.xlu0 %405 }
 0x5b5   :  { %v410_v23 = vsub.f32 %v402_v16, %v406_v22 }
 0x5b7   :  { %v412_v24 = vmul.f32 1.442695, %v410_v23 }
 0x5b9   :  { %1028 = vpow2.f32 %v412_v24 }
 0x5bc   :  { %v409_v25 = vpop.xlane.xlu0 %408 }
 0x5bd   :  { %v411_v26 = vsub.f32 %v403_v19, %v409_v25 }
 0x5bf   :  { %v1029_v27 = vpop.eup %1028  ;;  %v414_v29 = vmul.f32 1.442695, %v411_v26 }
 0x5c0   :  { %v416_v30 = vsel %vm201_vm3, %v1029_v27, 0.0 }
 0x5c1   :  { %1030 = vpow2.f32 %v414_v29  ;;  %417 = vadd.xlane.f32.xlu0 %v416_v30  ;;  %v1002_v29 = vld [vmem:[%s1314_s7 + $0x18] sm:$0xff]  ;;  %v1071_v30 = vmov 0  }
 0x5c2   :  { %1013 = vset.pattern.permute.xlu1 %v1071_v30  ;;  %721 = vmatpush.bf16.msra.mxu1 %v1002_v29 }
 0x5c7   :  { %v1031_v31 = vpop.eup %1030 }
 0x5c8   :  { %v419_v32 = vsel %vm201_vm3, %v1031_v31, 0.0 }
 0x5c9   :  { %420 = vadd.xlane.f32.xlu0 %v419_v32  ;;  %v1000_v32 = vld [vmem:[%s1314_s7 + $0x8] sm:$0xff] }
 0x634   :  { %v418_v33 = vpop.xlane.xlu0 %417 }
 0x635   :  { %1032 = vrcp.f32 %v418_v33 }
 0x63b   :  { %v1033_v35 = vpop.eup %1032 }
 0x63c   :  { %v421_v34 = vpop.xlane.xlu0 %420  ;;  %v424_v37 = vmul.f32 %v1033_v35, %v1029_v27  ;;  %v670_v27 = vld [vmem:[%s1310_s3] sm:$0x3] }
 0x63d   :  { %1034 = vrcp.f32 %v421_v34  ;;  %v1017_v34 = vld [vmem:[%s1313_s6 + $0x2] ss:$0 sm:$0xff] }
 0x643   :  { %v1035_v36 = vpop.eup %1034 }
 0x644   :  { %v425_v38 = vmul.f32 %v1035_v36, %v1031_v31  ;;  %v1001_v31 = vld [vmem:[%s1314_s7 + $0x10] sm:$0xff] }
 0x645   :  { %722 = vmatpush.bf16.msra.mxu1 %v1001_v31 }
 0x646   :  { %v426_v39 = vpack.c.bf16 %v425_v38, %v424_v37 }
 0x648   :  { %887 = vmatmul.msk.bf16.vlgmr.msrb.gmra.mxu0 %vm201_vm3, %v426_v39 }
 0x649   :  { %723 = vmatpush.bf16.msra.mxu1 %v1000_v32 }
 0x64d   :  { %724 = vmatpush.bf16.msra.mxu1 %v999_v43 }
 0x6c5   :  { %v442_v45 = vpop.f32.mrf.mxu0 }
 0x6c6   :  { %v443_v47 = vadd.f32 %v1016_v46, %v442_v45  ;;  %v1005_v45 = vld [vmem:[%s1316_s9 + $0x10] sm:$0xff] }
 0x6c7   :  { %776 = vmatpush.bf16.msra.mxu3 %v1005_v45 }
 0x6c8   :  { %v447_v50 = vmax.f32 %v443_v47, 0.0 }
 0x6cd   :  { %v444_v48 = vpop.f32.mrf.mxu0 }
 0x6ce   :  { %v445_v49 = vadd.f32 %v1016_v46, %v444_v48 }
 0x6d0   :  { %v448_v51 = vmax.f32 %v445_v49, 0.0 }
 0x6d2   :  { %v469_v52 = vpack.c.bf16 %v448_v51, %v447_v50  ;;  %v1004_v51 = vld [vmem:[%s1316_s9 + $0x8] sm:$0xff] }
 0x6d3   :  { %777 = vmatpush.bf16.msra.mxu3 %v1004_v51 }
 0x6d4   :  { %921 = vmatmul.msk.bf16.vlgmr.msrb.gmra.mxu1 %vm86_vm0, %v469_v52  ;;  %v1003_v52 = vld [vmem:[%s1316_s9] sm:$0xff] }
 0x6d7   :  { %778 = vmatpush.bf16.msra.mxu3 %v1003_v52 }
 0x751   :  { %v506_v56 = vpop.f32.mrf.mxu1 }
 0x759   :  { %v508_v57 = vpop.f32.mrf.mxu1 }
 0x75a   :  { %v511_v58 = vpack.c.bf16 %v508_v57, %v506_v56 }
 0x75c   :  { %938 = vmatmul.msk.bf16.vlgmr.msrb.gmra.mxu3 %vm86_vm0, %v511_v58  ;;  %642 = vmatpush.bf16.msra.mxu2 %v511_v58 }
 0x7df   :  { %v548_v59 = vpop.f32.mrf.mxu3 }
 0x7e0   :  { %587 = vperm.xlu0 %1011, %v548_v59  }
 0x7e7   :  { %v550_v60 = vpop.f32.mrf.mxu3 }
 0x7e8   :  { %592 = vperm.xlu2 %1012, %v550_v60  }
 0x802   :  { %553 = vxpose.xlu0.b32.start [1/2] (short) (narrow) %v548_v59, 8  ;;  %v1019_v59 = vld [vmem:[%s1317_s10] ss:$0 sm:$0xff] }
 0x80a   :  { %554 = vxpose.xlu0.b32.end [2/2] (short) (narrow) %v550_v60, 8 }
 0x842   :  { %v593_v0 = vpop.permute.xlu2 %592 }
 0x852   :  { %v588_v61 = vpop.permute.xlu0 %587 }
 0x871   :  { %1014 = vset.pattern.permute.xlu0 %v1071_v30 }
 0x8a6   :  { %v569_v62 = vpop.trf.xlu0 }
 0x8a7   :  { %v595_v63 = vperm.slane %v569_v62, 0 }
 0x8a9   :  { %v596_v1 = vadd.f32 %v595_v63, %v588_v61  ;;  %v597_v2 = vadd.f32 %v595_v63, %v593_v0 }
 0x8ab   :  { %v600_v3 = vmul.f32 0.2, %v596_v1  ;;  %vm598_vm8 = vcmp.gt.f32.partialorder %v596_v1, 0.0  ;;  %v601_v4 = vmul.f32 0.2, %v597_v2  ;;  %vm599_vm9 = vcmp.gt.f32.partialorder %v597_v2, 0.0 }
 0x8ad   :  { %v602_v5 = vsel %vm598_vm8, %v596_v1, %v600_v3  ;;  %v603_v8 = vsel %vm599_vm9, %v597_v2, %v601_v4 }
 0x8ae   :  { %v604_v6 = vsel %vm197_vm2, %v602_v5, -1e+30  ;;  %v605_v9 = vsel %vm198_vm5, %v603_v8, -1e+30 }
 0x8af   :  { %v606_v7 = vsel %vm201_vm3, %v604_v6, -inf  ;;  %v609_v10 = vsel %vm201_vm3, %v605_v9, -inf }
 0x8b0   :  { %607 = vmax.xlane.f32.xlu1 %v606_v7 }
 0x8b8   :  { %610 = vmax.xlane.f32.xlu1 %v609_v10 }
 0x923   :  { %v608_v11 = vpop.xlane.xlu1 %607 }
 0x924   :  { %v612_v12 = vsub.f32 %v604_v6, %v608_v11 }
 0x926   :  { %v614_v13 = vmul.f32 1.442695, %v612_v12 }
 0x928   :  { %1036 = vpow2.f32 %v614_v13 }
 0x92b   :  { %v611_v14 = vpop.xlane.xlu1 %610 }
 0x92c   :  { %v613_v15 = vsub.f32 %v605_v9, %v611_v14 }
 0x92e   :  { %v1037_v16 = vpop.eup %1036  ;;  %v616_v21 = vmul.f32 1.442695, %v613_v15 }
 0x92f   :  { %v618_v17 = vsel %vm201_vm3, %v1037_v16, 0.0 }
 0x930   :  { %1038 = vpow2.f32 %v616_v21  ;;  %619 = vadd.xlane.f32.xlu1 %v618_v17 }
 0x936   :  { %v1039_v18 = vpop.eup %1038 }
 0x937   :  { %v621_v19 = vsel %vm201_vm3, %v1039_v18, 0.0 }
 0x938   :  { %622 = vadd.xlane.f32.xlu1 %v621_v19 }
 0x951   :  { %673 = vperm.xlu1 %1013, %v670_v27  }
 0x9a3   :  { %v620_v28 = vpop.xlane.xlu1 %619 }
 0x9a4   :  { %1040 = vrcp.f32 %v620_v28 }
 0x9aa   :  { %v1041_v22 = vpop.eup %1040 }
 0x9ab   :  { %v623_v20 = vpop.xlane.xlu1 %622  ;;  %v626_v24 = vmul.f32 %v1041_v22, %v1037_v16 }
 0x9ac   :  { %1042 = vrcp.f32 %v623_v20 }
 0x9b2   :  { %v1043_v23 = vpop.eup %1042 }
 0x9b3   :  { %v627_v25 = vmul.f32 %v1043_v23, %v1039_v18 }
 0x9b5   :  { %v628_v26 = vpack.c.bf16 %v627_v25, %v626_v24 }
 0x9b7   :  { %939 = vmatmul.msk.bf16.vlgmr.msra.gmra.mxu2 %vm201_vm3, %v628_v26 }
 0x9c3   :  { %v674_v46 = vpop.permute.xlu1 %673 }
 0xa3a   :  { %v644_v33 = vpop.f32.mrf.mxu2 }
 0xa3b   :  { %v645_v35 = vadd.f32 %v1017_v34, %v644_v33 }
 0xa3d   :  { %v649_v38 = vmax.f32 %v645_v35, 0.0 }
 0xa42   :  { %v646_v36 = vpop.f32.mrf.mxu2 }
 0xa43   :  { %v647_v37 = vadd.f32 %v1017_v34, %v646_v36 }
 0xa45   :  { %v650_v39 = vmax.f32 %v647_v37, 0.0 }
 0xa47   :  { %v653_v41 = vpack.c.bf16 %v650_v39, %v649_v38 }
 0xa49   :  { %664 = vmatpush.bf16.msra.mxu0 %v653_v41 }
 0xa4c   :  { %940 = vmatmul.msk.bf16.vlgmr.msra.gmra.mxu0 %vm201_vm3, %v652_v42 }
 0xac9   :  { %v666_v47 = vpop.f32.mrf.mxu0 }
 0xaca   :  { %v676_v48 = vmul.f32 %v674_v46, %v666_v47 }
 0xacc   :  { %v677_v49 = vpack.c.bf16 %v676_v48, %v676_v48 }
 0xace   :  { %957 = vmatmul.msk.bf16.vlgmr.msra.gmra.mxu1 %vm86_vm0, %v677_v49 }
 0xad1   :  { %v668_v50 = vpop.f32.mrf.mxu0 }
 0xb4b   :  { %v726_v54 = vpop.f32.mrf.mxu1 }
 0xb4c   :  { %v727_v55 = vadd.f32 %v1018_v53, %v726_v54 }
 0xb4e   :  { %v730_v56 = vmax.f32 %v727_v55, 0.0 }
 0xb50   :  { %v731_v57 = vpack.c.bf16 %v730_v56, %v730_v56 }
 0xb52   :  { %974 = vmatmul.msk.bf16.vlgmr.msra.gmra.mxu3 %vm86_vm0, %v731_v57 }
 0xb53   :  { %v728_v58 = vpop.f32.mrf.mxu1 }
 0xbd5   :  { %v780_v60 = vpop.f32.mrf.mxu3 }
 0xbd6   :  { %v781_v61 = vadd.f32 %v1019_v59, %v780_v60 }
 0xbd8   :  { %784 = vst [vmem:[#allocation2] sm:$0x3] %v781_v61 }
 0xbd9   :  { %795 = dma.vmem_to_hbm [thread:$0]  %s791_s5, 32, %s793_s16, [#allocation3]  }
 0xbdd   :  { %v782_v62 = vpop.f32.mrf.mxu3 }
 0xbde   :  { %1068 = dma.done.wait [#allocation3], 32  }
 0xbdf   :  { %1069 = vsyncadd [#allocation3], 4294967264 }
 0xbe0   :  { %800 = vsyncpa [#allocation3], 1 }

</bundles_post_ra>
